<compile_context>
chip_gen: v5e
topology: v5e:2x2
jax: 0.10.0
libtpu: 0.0.40
codegen_flags: <defaults>
</compile_context>

<pallas_src>
import functools

import jax
import jax.numpy as jnp
import numpy as np
from jax.experimental import pallas as pl
from jax.experimental.pallas import tpu as pltpu

HALF_LOG_2PI = 0.5 * float(np.log(2.0 * np.pi))
OUT_WIDTH = 128  # lane-dense packed output slab width


def _lstm_layer_c0(x16, h16, wx_rf, wx_base, wh_rf, wh_base, b_rf, b_base, hidden):
    """PyTorch LSTMCell with c == 0 (forget gate dead): h' = o * tanh(i * g).

    x16 / h16: bf16 activations.  wx_rf / wh_rf: per-gate weight slabs, indexed
    wx_rf[wx_base + k] with k in {0: i, 1: g, 2: o}.  Biases (b_ih + b_hh) live
    in rows b_base..b_base+2 of b_rf (f32).
    """
    def pre(k):
        return (jnp.dot(x16, wx_rf[wx_base + k], preferred_element_type=jnp.float32)
                + jnp.dot(h16, wh_rf[wh_base + k], preferred_element_type=jnp.float32)
                + b_rf[b_base + k:b_base + k + 1, 0:hidden])

    i = jax.nn.sigmoid(pre(0))
    g = jnp.tanh(pre(1))
    o = jax.nn.sigmoid(pre(2))
    return o * jnp.tanh(i * g)


def _policy_math(state_rf, enc_rf, gumbel_rf, eps_rf,
                 w_ih0_rf, w_sq_rf, w_head_rf, b_rf,
                 *, hidden, num_actions, act_lim, out_width):
    """Shared math, usable on Pallas refs (in-kernel) or jnp arrays (reference).

    Returns the packed (rows, out_width) output slab:
      lanes [0, A)      one-hot decision
      lane  A           final_action_values
      lane  A + 1       log_prob
      lanes [A+2, ...)  zeros
    """
    A = num_actions
    f32, bf16 = jnp.float32, jnp.bfloat16

    x16 = state_rf[...].astype(bf16)
    enc16 = enc_rf[...].astype(bf16)

    # layer 0: input = state, hidden = (encoding, zeros)
    h1 = _lstm_layer_c0(x16, enc16, w_ih0_rf, 0, w_sq_rf, 0, b_rf, 0, hidden)
    # layer 1: input = h1, hidden = (encoding, zeros)   [reference quirk]
    h2 = _lstm_layer_c0(h1.astype(bf16), enc16, w_sq_rf, 3, w_sq_rf, 6, b_rf, 3, hidden)

    # fused heads: [logits | mean | logstd] in one (H, 3A) matmul
    heads = (jnp.dot(h2.astype(bf16), w_head_rf[...], preferred_element_type=f32)
             + b_rf[6:7, 0:3 * A])
    logits = heads[:, 0:A]
    mean = heads[:, A:2 * A]
    logstd = heads[:, 2 * A:3 * A]          # exp input stays f32
    std = jnp.exp(logstd)

    gumbel = gumbel_rf[...]
    eps = eps_rf[...]

    # --- OneHotCategorical sample via Gumbel-max (tie-break: first max) ---
    z = logits + gumbel
    zmax = jnp.max(z, axis=-1, keepdims=True)
    colA = jax.lax.broadcasted_iota(jnp.int32, z.shape, 1)
    first = jnp.min(jnp.where(z == zmax, colA, A), axis=-1, keepdims=True)  # (rows,1)
    onehot = (colA == first).astype(f32)

    # log_prob(decision) = sum(decision * log_softmax(logits))
    lmax = jnp.max(logits, axis=-1, keepdims=True)
    lse = jnp.log(jnp.sum(jnp.exp(logits - lmax), axis=-1, keepdims=True)) + lmax
    decision_log_prob = jnp.sum(onehot * (logits - lse), axis=-1, keepdims=True)

    # --- Normal samples for dims 0..A-2; last dim ("do nothing") is 0 ---
    samples = mean + std * eps
    sample_lp = -0.5 * eps * eps - logstd - HALF_LOG_2PI
    cont = (colA < (A - 1)).astype(f32)
    value = jnp.sum(samples * cont * onehot, axis=-1, keepdims=True) * act_lim
    log_prob = decision_log_prob + jnp.sum(sample_lp * cont * onehot,
                                           axis=-1, keepdims=True)

    # --- build lane-dense packed output slab (rows, out_width) ---
    rows = z.shape[0]
    colW = jax.lax.broadcasted_iota(jnp.int32, (rows, out_width), 1)
    out = (colW == first).astype(f32)            # decision one-hot (first < A)
    out = jnp.where(colW == A, value, out)       # value in lane A
    out = jnp.where(colW == A + 1, log_prob, out)  # log_prob in lane A+1
    return out


def policy_kernel(state_ref, enc_ref, gumbel_ref, eps_ref,
                  w_ih0_ref, w_sq_ref, w_head_ref, b_ref,
                  out_ref, *, hidden, num_actions, act_lim, out_width):
    out_ref[...] = _policy_math(state_ref, enc_ref, gumbel_ref, eps_ref,
                                w_ih0_ref, w_sq_ref, w_head_ref, b_ref,
                                hidden=hidden, num_actions=num_actions,
                                act_lim=act_lim, out_width=out_width)


def policy_net_forward(state, encoding, params, gumbel, eps, *,
                       hidden, num_actions, act_lim=1.0, tb=8):
    """Run the packed PolicyNet kernel over a batch grid.

    tb: rows per grid step (multiple of 8).  For large rollout batches raise tb
    (e.g. 256-512) to reach the memory roofline; 8 keeps the demo tiny.
    """
    assert tb % 8 == 0, "tb must be a multiple of the f32 sublane count (8)"
    A = num_actions
    assert A + 2 <= OUT_WIDTH
    B, S = state.shape

    # pad batch to a multiple of tb (padded rows compute garbage, sliced away)
    Bp = ((B + tb - 1) // tb) * tb
    if Bp != B:
        padfn = lambda x: jnp.pad(x, ((0, Bp - B), (0, 0)))
        state, encoding, gumbel, eps = map(padfn, (state, encoding, gumbel, eps))

    def batch_spec(feat):
        return pl.BlockSpec((tb, feat), lambda b: (b, 0))

    def const_spec(a):
        return pl.BlockSpec(a.shape, lambda b, _nd=a.ndim: (0,) * _nd)

    kernel = functools.partial(policy_kernel, hidden=hidden, num_actions=A,
                               act_lim=float(act_lim), out_width=OUT_WIDTH)

    out = pl.pallas_call(
        kernel,
        out_shape=jax.ShapeDtypeStruct((Bp, OUT_WIDTH), jnp.float32),
        grid=(Bp // tb,),
        in_specs=[batch_spec(S), batch_spec(hidden), batch_spec(A), batch_spec(A),
                  const_spec(params["w_ih0"]), const_spec(params["w_sq"]),
                  const_spec(params["w_head"]), const_spec(params["b"])],
        out_specs=pl.BlockSpec((tb, OUT_WIDTH), lambda b: (b, 0)),
        compiler_params=pltpu.CompilerParams(
            dimension_semantics=("parallel",)),
    )(state, encoding, gumbel, eps,
      params["w_ih0"], params["w_sq"], params["w_head"], params["b"])

    out = out[:B]
    return out[:, :A], out[:, A], out[:, A + 1]


# ---------------------------------------------------------------------------
# Parameter construction (PyTorch-layout init -> packed kernel slabs)
# ---------------------------------------------------------------------------

def init_torch_params(key, state_size, hidden, num_actions):
    """Deterministic init mirroring PyTorch uniform(-1/sqrt(fan), 1/sqrt(fan))."""
    ks = jax.random.split(key, 14)
    klstm = 1.0 / np.sqrt(hidden)
    klin = 1.0 / np.sqrt(hidden)

    def u(k, shape, lim):
        return jax.random.uniform(k, shape, jnp.float32, -lim, lim)

    return {
        "wih0": u(ks[0], (4 * hidden, state_size), klstm),
        "whh0": u(ks[1], (4 * hidden, hidden), klstm),
        "bih0": u(ks[2], (4 * hidden,), klstm),
        "bhh0": u(ks[3], (4 * hidden,), klstm),
        "wih1": u(ks[4], (4 * hidden, hidden), klstm),
        "whh1": u(ks[5], (4 * hidden, hidden), klstm),
        "bih1": u(ks[6], (4 * hidden,), klstm),
        "bhh1": u(ks[7], (4 * hidden,), klstm),
        "wdec": u(ks[8], (num_actions, hidden), klin),
        "bdec": u(ks[9], (num_actions,), klin),
        "wmean": u(ks[10], (num_actions, hidden), klin),
        "bmean": u(ks[11], (num_actions,), klin),
        "wlstd": u(ks[12], (num_actions, hidden), klin),
        "blstd": u(ks[13], (num_actions,), klin),
    }


def pack_params(p, hidden, num_actions):
    """Pack PyTorch-layout weights into the kernel's 4 slabs (bf16 weights, f32 bias)."""
    H, A = hidden, num_actions
    # PyTorch LSTMCell gate row order: i, f, g, o.  Keep i, g, o (f-gate dead: c == 0).
    gate_rows = [slice(0, H), slice(2 * H, 3 * H), slice(3 * H, 4 * H)]

    def per_gate_T(w):                       # (4H, in) -> (3, in, H)
        return jnp.stack([w[r].T for r in gate_rows], axis=0)

    w_ih0 = per_gate_T(p["wih0"])                                    # (3, S, H)
    w_sq = jnp.concatenate([per_gate_T(p["whh0"]),                   # 0..2: whh0 i,g,o
                            per_gate_T(p["wih1"]),                   # 3..5: wih1 i,g,o
                            per_gate_T(p["whh1"])], axis=0)          # 6..8: whh1 i,g,o
    w_head = jnp.concatenate([p["wdec"].T, p["wmean"].T, p["wlstd"].T], axis=1)  # (H, 3A)

    b0 = p["bih0"] + p["bhh0"]
    b1 = p["bih1"] + p["bhh1"]
    bw = max(H, 3 * A)

    def pad_row(v):
        return jnp.pad(v, (0, bw - v.shape[0])).reshape(1, bw)

    rows = ([pad_row(b0[r]) for r in gate_rows]
            + [pad_row(b1[r]) for r in gate_rows]
            + [pad_row(jnp.concatenate([p["bdec"], p["bmean"], p["blstd"]]))])
    b_slab = jnp.concatenate(rows, axis=0)                           # (7, bw)

    return {
        "w_ih0": w_ih0.astype(jnp.bfloat16),
        "w_sq": w_sq.astype(jnp.bfloat16),
        "w_head": w_head.astype(jnp.bfloat16),
        "b": b_slab.astype(jnp.float32),
    }


if __name__ == "__main__":
    B, S, H, A = 16, 16, 32, 4        # batch, state_size, hidden_size, num_actions
    ACT_LIM = 1.0

    root = jax.random.PRNGKey(0)
    kp, kstate, kenc, kgum, keps = jax.random.split(root, 5)

    params = pack_params(init_torch_params(kp, S, H, A), H, A)
    state = jax.random.normal(kstate, (B, S), jnp.float32)
    encoding = jax.random.normal(kenc, (B, H), jnp.float32)

    # Raw distribution noise drawn outside the kernel (glue); sampling
    # transforms happen inside the kernel.
    u = jax.random.uniform(kgum, (B, A), jnp.float32, 1e-6, 1.0 - 1e-6)
    gumbel = -jnp.log(-jnp.log(u))
    eps = jax.random.normal(keps, (B, A), jnp.float32)

    decision, values, log_prob = policy_net_forward(
        state, encoding, params, gumbel, eps,
        hidden=H, num_actions=A, act_lim=ACT_LIM, tb=8)
    jax.block_until_ready((decision, values, log_prob))

    # Pure-JAX reference of the identical packed math for a sanity check.
    ref = _policy_math(state, encoding, gumbel, eps,
                       params["w_ih0"], params["w_sq"],
                       params["w_head"], params["b"],
                       hidden=H, num_actions=A, act_lim=ACT_LIM,
                       out_width=OUT_WIDTH)
    np.testing.assert_allclose(np.asarray(decision), np.asarray(ref[:, :A]),
                               rtol=0, atol=0)
    np.testing.assert_allclose(np.asarray(values), np.asarray(ref[:, A]),
                               rtol=5e-3, atol=5e-3)
    np.testing.assert_allclose(np.asarray(log_prob), np.asarray(ref[:, A + 1]),
                               rtol=5e-3, atol=5e-3)

    print("KERNEL_OK")
</pallas_src>

<mosaic_0001>
module attributes {stable_mosaic.version = 11 : i64} {
  func.func @policy_kernel(%arg0: i32, %arg1: memref<8x16xf32, #tpu.memory_space<vmem>>, %arg2: memref<8x32xf32, #tpu.memory_space<vmem>>, %arg3: memref<8x4xf32, #tpu.memory_space<vmem>>, %arg4: memref<8x4xf32, #tpu.memory_space<vmem>>, %arg5: memref<3x16x32xbf16, #tpu.memory_space<vmem>>, %arg6: memref<9x32x32xbf16, #tpu.memory_space<vmem>>, %arg7: memref<32x12xbf16, #tpu.memory_space<vmem>>, %arg8: memref<7x32xf32, #tpu.memory_space<vmem>>, %arg9: memref<8x128xf32, #tpu.memory_space<vmem>>) attributes {dimension_semantics = [#tpu.dimension_semantics<parallel>], iteration_bounds = array<i64: 2>, scalar_prefetch = 0 : i64, scratch_operands = 0 : i64, tpu.core_type = #tpu.core_type<tc>, window_params = [{transform_indices = @transform_0, window_bounds = array<i64: 8, 16>}, {transform_indices = @transform_1, window_bounds = array<i64: 8, 32>}, {transform_indices = @transform_2, window_bounds = array<i64: 8, 4>}, {transform_indices = @transform_3, window_bounds = array<i64: 8, 4>}, {pipeline_mode = #tpu.pipeline_mode<synchronous>, transform_indices = @transform_4, window_bounds = array<i64: 3, 16, 32>}, {pipeline_mode = #tpu.pipeline_mode<synchronous>, transform_indices = @transform_5, window_bounds = array<i64: 9, 32, 32>}, {pipeline_mode = #tpu.pipeline_mode<synchronous>, transform_indices = @transform_6, window_bounds = array<i64: 32, 12>}, {pipeline_mode = #tpu.pipeline_mode<synchronous>, transform_indices = @transform_7, window_bounds = array<i64: 7, 32>}, {transform_indices = @transform_8, window_bounds = array<i64: 8, 128>}]} {
    %c0 = arith.constant 0 : index
    %c0_0 = arith.constant 0 : index
    %0 = vector.load %arg1[%c0, %c0_0] : memref<8x16xf32, #tpu.memory_space<vmem>>, vector<8x16xf32>
    %1 = arith.truncf %0 : vector<8x16xf32> to vector<8x16xbf16>
    %c0_1 = arith.constant 0 : index
    %c0_2 = arith.constant 0 : index
    %2 = vector.load %arg2[%c0_1, %c0_2] : memref<8x32xf32, #tpu.memory_space<vmem>>, vector<8x32xf32>
    %3 = arith.truncf %2 : vector<8x32xf32> to vector<8x32xbf16>
    %c0_3 = arith.constant 0 : index
    %c0_4 = arith.constant 0 : index
    %c0_5 = arith.constant 0 : index
    %4 = vector.load %arg5[%c0_3, %c0_4, %c0_5] : memref<3x16x32xbf16, #tpu.memory_space<vmem>>, vector<1x16x32xbf16>
    %5 = vector.shape_cast %4 : vector<1x16x32xbf16> to vector<16x32xbf16>
    %cst = arith.constant dense<0.000000e+00> : vector<8x32xf32>
    %6 = tpu.matmul %1, %5, %cst {dimension_numbers = #tpu.dot_dimension_numbers<[1], [0], [0], [1], [0, 0, 1, 1], [], []>} : vector<8x16xbf16>, vector<16x32xbf16>, vector<8x32xf32> -> vector<8x32xf32>
    %c0_6 = arith.constant 0 : index
    %c0_7 = arith.constant 0 : index
    %c0_8 = arith.constant 0 : index
    %7 = vector.load %arg6[%c0_6, %c0_7, %c0_8] : memref<9x32x32xbf16, #tpu.memory_space<vmem>>, vector<1x32x32xbf16>
    %8 = vector.shape_cast %7 : vector<1x32x32xbf16> to vector<32x32xbf16>
    %cst_9 = arith.constant dense<0.000000e+00> : vector<8x32xf32>
    %9 = tpu.matmul %3, %8, %cst_9 {dimension_numbers = #tpu.dot_dimension_numbers<[1], [0], [0], [1], [0, 0, 1, 1], [], []>} : vector<8x32xbf16>, vector<32x32xbf16>, vector<8x32xf32> -> vector<8x32xf32>
    %10 = arith.addf %6, %9 : vector<8x32xf32>
    %c0_10 = arith.constant 0 : index
    %c0_11 = arith.constant 0 : index
    %11 = vector.load %arg8[%c0_10, %c0_11] : memref<7x32xf32, #tpu.memory_space<vmem>>, vector<1x32xf32>
    %12 = vector.broadcast %11 : vector<1x32xf32> to vector<8x32xf32>
    %13 = arith.addf %10, %12 : vector<8x32xf32>
    %14 = arith.negf %13 : vector<8x32xf32>
    %15 = math.exp %14 : vector<8x32xf32>
    %cst_12 = arith.constant 1.000000e+00 : f32
    %16 = vector.broadcast %cst_12 : f32 to vector<8x32xf32>
    %17 = arith.addf %16, %15 : vector<8x32xf32>
    %18 = arith.divf %16, %17 : vector<8x32xf32>
    %c1 = arith.constant 1 : index
    %c0_13 = arith.constant 0 : index
    %c0_14 = arith.constant 0 : index
    %19 = vector.load %arg5[%c1, %c0_13, %c0_14] : memref<3x16x32xbf16, #tpu.memory_space<vmem>>, vector<1x16x32xbf16>
    %20 = vector.shape_cast %19 : vector<1x16x32xbf16> to vector<16x32xbf16>
    %cst_15 = arith.constant dense<0.000000e+00> : vector<8x32xf32>
    %21 = tpu.matmul %1, %20, %cst_15 {dimension_numbers = #tpu.dot_dimension_numbers<[1], [0], [0], [1], [0, 0, 1, 1], [], []>} : vector<8x16xbf16>, vector<16x32xbf16>, vector<8x32xf32> -> vector<8x32xf32>
    %c1_16 = arith.constant 1 : index
    %c0_17 = arith.constant 0 : index
    %c0_18 = arith.constant 0 : index
    %22 = vector.load %arg6[%c1_16, %c0_17, %c0_18] : memref<9x32x32xbf16, #tpu.memory_space<vmem>>, vector<1x32x32xbf16>
    %23 = vector.shape_cast %22 : vector<1x32x32xbf16> to vector<32x32xbf16>
    %cst_19 = arith.constant dense<0.000000e+00> : vector<8x32xf32>
    %24 = tpu.matmul %3, %23, %cst_19 {dimension_numbers = #tpu.dot_dimension_numbers<[1], [0], [0], [1], [0, 0, 1, 1], [], []>} : vector<8x32xbf16>, vector<32x32xbf16>, vector<8x32xf32> -> vector<8x32xf32>
    %25 = arith.addf %21, %24 : vector<8x32xf32>
    %c1_20 = arith.constant 1 : index
    %c0_21 = arith.constant 0 : index
    %26 = vector.load %arg8[%c1_20, %c0_21] : memref<7x32xf32, #tpu.memory_space<vmem>>, vector<1x32xf32>
    %27 = vector.broadcast %26 : vector<1x32xf32> to vector<8x32xf32>
    %28 = arith.addf %25, %27 : vector<8x32xf32>
    %29 = math.tanh %28 : vector<8x32xf32>
    %c2 = arith.constant 2 : index
    %c0_22 = arith.constant 0 : index
    %c0_23 = arith.constant 0 : index
    %30 = vector.load %arg5[%c2, %c0_22, %c0_23] : memref<3x16x32xbf16, #tpu.memory_space<vmem>>, vector<1x16x32xbf16>
    %31 = vector.shape_cast %30 : vector<1x16x32xbf16> to vector<16x32xbf16>
    %cst_24 = arith.constant dense<0.000000e+00> : vector<8x32xf32>
    %32 = tpu.matmul %1, %31, %cst_24 {dimension_numbers = #tpu.dot_dimension_numbers<[1], [0], [0], [1], [0, 0, 1, 1], [], []>} : vector<8x16xbf16>, vector<16x32xbf16>, vector<8x32xf32> -> vector<8x32xf32>
    %c2_25 = arith.constant 2 : index
    %c0_26 = arith.constant 0 : index
    %c0_27 = arith.constant 0 : index
    %33 = vector.load %arg6[%c2_25, %c0_26, %c0_27] : memref<9x32x32xbf16, #tpu.memory_space<vmem>>, vector<1x32x32xbf16>
    %34 = vector.shape_cast %33 : vector<1x32x32xbf16> to vector<32x32xbf16>
    %cst_28 = arith.constant dense<0.000000e+00> : vector<8x32xf32>
    %35 = tpu.matmul %3, %34, %cst_28 {dimension_numbers = #tpu.dot_dimension_numbers<[1], [0], [0], [1], [0, 0, 1, 1], [], []>} : vector<8x32xbf16>, vector<32x32xbf16>, vector<8x32xf32> -> vector<8x32xf32>
    %36 = arith.addf %32, %35 : vector<8x32xf32>
    %c2_29 = arith.constant 2 : index
    %c0_30 = arith.constant 0 : index
    %37 = vector.load %arg8[%c2_29, %c0_30] : memref<7x32xf32, #tpu.memory_space<vmem>>, vector<1x32xf32>
    %38 = vector.broadcast %37 : vector<1x32xf32> to vector<8x32xf32>
    %39 = arith.addf %36, %38 : vector<8x32xf32>
    %40 = arith.negf %39 : vector<8x32xf32>
    %41 = math.exp %40 : vector<8x32xf32>
    %cst_31 = arith.constant 1.000000e+00 : f32
    %42 = vector.broadcast %cst_31 : f32 to vector<8x32xf32>
    %43 = arith.addf %42, %41 : vector<8x32xf32>
    %44 = arith.divf %42, %43 : vector<8x32xf32>
    %45 = arith.mulf %18, %29 : vector<8x32xf32>
    %46 = math.tanh %45 : vector<8x32xf32>
    %47 = arith.mulf %44, %46 : vector<8x32xf32>
    %48 = arith.truncf %47 : vector<8x32xf32> to vector<8x32xbf16>
    %c3 = arith.constant 3 : index
    %c0_32 = arith.constant 0 : index
    %c0_33 = arith.constant 0 : index
    %49 = vector.load %arg6[%c3, %c0_32, %c0_33] : memref<9x32x32xbf16, #tpu.memory_space<vmem>>, vector<1x32x32xbf16>
    %50 = vector.shape_cast %49 : vector<1x32x32xbf16> to vector<32x32xbf16>
    %cst_34 = arith.constant dense<0.000000e+00> : vector<8x32xf32>
    %51 = tpu.matmul %48, %50, %cst_34 {dimension_numbers = #tpu.dot_dimension_numbers<[1], [0], [0], [1], [0, 0, 1, 1], [], []>} : vector<8x32xbf16>, vector<32x32xbf16>, vector<8x32xf32> -> vector<8x32xf32>
    %c6 = arith.constant 6 : index
    %c0_35 = arith.constant 0 : index
    %c0_36 = arith.constant 0 : index
    %52 = vector.load %arg6[%c6, %c0_35, %c0_36] : memref<9x32x32xbf16, #tpu.memory_space<vmem>>, vector<1x32x32xbf16>
    %53 = vector.shape_cast %52 : vector<1x32x32xbf16> to vector<32x32xbf16>
    %cst_37 = arith.constant dense<0.000000e+00> : vector<8x32xf32>
    %54 = tpu.matmul %3, %53, %cst_37 {dimension_numbers = #tpu.dot_dimension_numbers<[1], [0], [0], [1], [0, 0, 1, 1], [], []>} : vector<8x32xbf16>, vector<32x32xbf16>, vector<8x32xf32> -> vector<8x32xf32>
    %55 = arith.addf %51, %54 : vector<8x32xf32>
    %c3_38 = arith.constant 3 : index
    %c0_39 = arith.constant 0 : index
    %56 = vector.load %arg8[%c3_38, %c0_39] : memref<7x32xf32, #tpu.memory_space<vmem>>, vector<1x32xf32>
    %57 = vector.broadcast %56 : vector<1x32xf32> to vector<8x32xf32>
    %58 = arith.addf %55, %57 : vector<8x32xf32>
    %59 = arith.negf %58 : vector<8x32xf32>
    %60 = math.exp %59 : vector<8x32xf32>
    %cst_40 = arith.constant 1.000000e+00 : f32
    %61 = vector.broadcast %cst_40 : f32 to vector<8x32xf32>
    %62 = arith.addf %61, %60 : vector<8x32xf32>
    %63 = arith.divf %61, %62 : vector<8x32xf32>
    %c4 = arith.constant 4 : index
    %c0_41 = arith.constant 0 : index
    %c0_42 = arith.constant 0 : index
    %64 = vector.load %arg6[%c4, %c0_41, %c0_42] : memref<9x32x32xbf16, #tpu.memory_space<vmem>>, vector<1x32x32xbf16>
    %65 = vector.shape_cast %64 : vector<1x32x32xbf16> to vector<32x32xbf16>
    %cst_43 = arith.constant dense<0.000000e+00> : vector<8x32xf32>
    %66 = tpu.matmul %48, %65, %cst_43 {dimension_numbers = #tpu.dot_dimension_numbers<[1], [0], [0], [1], [0, 0, 1, 1], [], []>} : vector<8x32xbf16>, vector<32x32xbf16>, vector<8x32xf32> -> vector<8x32xf32>
    %c7 = arith.constant 7 : index
    %c0_44 = arith.constant 0 : index
    %c0_45 = arith.constant 0 : index
    %67 = vector.load %arg6[%c7, %c0_44, %c0_45] : memref<9x32x32xbf16, #tpu.memory_space<vmem>>, vector<1x32x32xbf16>
    %68 = vector.shape_cast %67 : vector<1x32x32xbf16> to vector<32x32xbf16>
    %cst_46 = arith.constant dense<0.000000e+00> : vector<8x32xf32>
    %69 = tpu.matmul %3, %68, %cst_46 {dimension_numbers = #tpu.dot_dimension_numbers<[1], [0], [0], [1], [0, 0, 1, 1], [], []>} : vector<8x32xbf16>, vector<32x32xbf16>, vector<8x32xf32> -> vector<8x32xf32>
    %70 = arith.addf %66, %69 : vector<8x32xf32>
    %c4_47 = arith.constant 4 : index
    %c0_48 = arith.constant 0 : index
    %71 = vector.load %arg8[%c4_47, %c0_48] : memref<7x32xf32, #tpu.memory_space<vmem>>, vector<1x32xf32>
    %72 = vector.broadcast %71 : vector<1x32xf32> to vector<8x32xf32>
    %73 = arith.addf %70, %72 : vector<8x32xf32>
    %74 = math.tanh %73 : vector<8x32xf32>
    %c5 = arith.constant 5 : index
    %c0_49 = arith.constant 0 : index
    %c0_50 = arith.constant 0 : index
    %75 = vector.load %arg6[%c5, %c0_49, %c0_50] : memref<9x32x32xbf16, #tpu.memory_space<vmem>>, vector<1x32x32xbf16>
    %76 = vector.shape_cast %75 : vector<1x32x32xbf16> to vector<32x32xbf16>
    %cst_51 = arith.constant dense<0.000000e+00> : vector<8x32xf32>
    %77 = tpu.matmul %48, %76, %cst_51 {dimension_numbers = #tpu.dot_dimension_numbers<[1], [0], [0], [1], [0, 0, 1, 1], [], []>} : vector<8x32xbf16>, vector<32x32xbf16>, vector<8x32xf32> -> vector<8x32xf32>
    %c8 = arith.constant 8 : index
    %c0_52 = arith.constant 0 : index
    %c0_53 = arith.constant 0 : index
    %78 = vector.load %arg6[%c8, %c0_52, %c0_53] : memref<9x32x32xbf16, #tpu.memory_space<vmem>>, vector<1x32x32xbf16>
    %79 = vector.shape_cast %78 : vector<1x32x32xbf16> to vector<32x32xbf16>
    %cst_54 = arith.constant dense<0.000000e+00> : vector<8x32xf32>
    %80 = tpu.matmul %3, %79, %cst_54 {dimension_numbers = #tpu.dot_dimension_numbers<[1], [0], [0], [1], [0, 0, 1, 1], [], []>} : vector<8x32xbf16>, vector<32x32xbf16>, vector<8x32xf32> -> vector<8x32xf32>
    %81 = arith.addf %77, %80 : vector<8x32xf32>
    %c5_55 = arith.constant 5 : index
    %c0_56 = arith.constant 0 : index
    %82 = vector.load %arg8[%c5_55, %c0_56] : memref<7x32xf32, #tpu.memory_space<vmem>>, vector<1x32xf32>
    %83 = vector.broadcast %82 : vector<1x32xf32> to vector<8x32xf32>
    %84 = arith.addf %81, %83 : vector<8x32xf32>
    %85 = arith.negf %84 : vector<8x32xf32>
    %86 = math.exp %85 : vector<8x32xf32>
    %cst_57 = arith.constant 1.000000e+00 : f32
    %87 = vector.broadcast %cst_57 : f32 to vector<8x32xf32>
    %88 = arith.addf %87, %86 : vector<8x32xf32>
    %89 = arith.divf %87, %88 : vector<8x32xf32>
    %90 = arith.mulf %63, %74 : vector<8x32xf32>
    %91 = math.tanh %90 : vector<8x32xf32>
    %92 = arith.mulf %89, %91 : vector<8x32xf32>
    %93 = arith.truncf %92 : vector<8x32xf32> to vector<8x32xbf16>
    %c0_58 = arith.constant 0 : index
    %c0_59 = arith.constant 0 : index
    %94 = vector.load %arg7[%c0_58, %c0_59] : memref<32x12xbf16, #tpu.memory_space<vmem>>, vector<32x12xbf16>
    %cst_60 = arith.constant dense<0.000000e+00> : vector<8x12xf32>
    %95 = tpu.matmul %93, %94, %cst_60 {dimension_numbers = #tpu.dot_dimension_numbers<[1], [0], [0], [1], [0, 0, 1, 1], [], []>} : vector<8x32xbf16>, vector<32x12xbf16>, vector<8x12xf32> -> vector<8x12xf32>
    %c6_61 = arith.constant 6 : index
    %c0_62 = arith.constant 0 : index
    %96 = vector.load %arg8[%c6_61, %c0_62] : memref<7x32xf32, #tpu.memory_space<vmem>>, vector<1x12xf32>
    %97 = vector.broadcast %96 : vector<1x12xf32> to vector<8x12xf32>
    %98 = arith.addf %95, %97 : vector<8x12xf32>
    %99 = vector.extract_strided_slice %98 {offsets = [0, 0], sizes = [8, 4], strides = [1, 1]} : vector<8x12xf32> to vector<8x4xf32>
    %100 = vector.extract_strided_slice %98 {offsets = [0, 4], sizes = [8, 4], strides = [1, 1]} : vector<8x12xf32> to vector<8x4xf32>
    %101 = vector.extract_strided_slice %98 {offsets = [0, 8], sizes = [8, 4], strides = [1, 1]} : vector<8x12xf32> to vector<8x4xf32>
    %102 = math.exp %101 : vector<8x4xf32>
    %c0_63 = arith.constant 0 : index
    %c0_64 = arith.constant 0 : index
    %103 = vector.load %arg3[%c0_63, %c0_64] : memref<8x4xf32, #tpu.memory_space<vmem>>, vector<8x4xf32>
    %c0_65 = arith.constant 0 : index
    %c0_66 = arith.constant 0 : index
    %104 = vector.load %arg4[%c0_65, %c0_66] : memref<8x4xf32, #tpu.memory_space<vmem>>, vector<8x4xf32>
    %105 = arith.addf %99, %103 : vector<8x4xf32>
    %cst_67 = arith.constant dense<0xFF800000> : vector<8xf32>
    %106 = vector.multi_reduction <maximumf>, %105, %cst_67 [1] : vector<8x4xf32> to vector<8xf32>
    %107 = vector.shape_cast %106 : vector<8xf32> to vector<8x1xf32>
    %108 = tpu.iota {dimensions = array<i32: 1>} : vector<8x4xi32>
    %109 = vector.broadcast %107 : vector<8x1xf32> to vector<8x4xf32>
    %110 = arith.cmpf oeq, %105, %109 : vector<8x4xf32>
    %c4_i32 = arith.constant 4 : i32
    %111 = vector.broadcast %c4_i32 : i32 to vector<8x4xi32>
    %112 = arith.select %110, %108, %111 : vector<8x4xi1>, vector<8x4xi32>
    %cst_68 = arith.constant dense<2147483647> : vector<8xi32>
    %113 = vector.multi_reduction <minsi>, %112, %cst_68 [1] : vector<8x4xi32> to vector<8xi32>
    %114 = vector.shape_cast %113 : vector<8xi32> to vector<8x1xi32>
    %115 = vector.broadcast %114 : vector<8x1xi32> to vector<8x4xi32>
    %116 = arith.cmpi eq, %108, %115 : vector<8x4xi32>
    %117 = arith.extui %116 : vector<8x4xi1> to vector<8x4xi32>
    %118 = arith.sitofp %117 : vector<8x4xi32> to vector<8x4xf32>
    %cst_69 = arith.constant dense<0xFF800000> : vector<8xf32>
    %119 = vector.multi_reduction <maximumf>, %99, %cst_69 [1] : vector<8x4xf32> to vector<8xf32>
    %120 = vector.shape_cast %119 : vector<8xf32> to vector<8x1xf32>
    %121 = vector.broadcast %120 : vector<8x1xf32> to vector<8x4xf32>
    %122 = arith.subf %99, %121 : vector<8x4xf32>
    %123 = math.exp %122 : vector<8x4xf32>
    %cst_70 = arith.constant dense<0.000000e+00> : vector<8xf32>
    %124 = vector.multi_reduction <add>, %123, %cst_70 [1] : vector<8x4xf32> to vector<8xf32>
    %125 = vector.shape_cast %124 : vector<8xf32> to vector<8x1xf32>
    %126 = math.log %125 : vector<8x1xf32>
    %127 = arith.addf %126, %120 : vector<8x1xf32>
    %128 = vector.broadcast %127 : vector<8x1xf32> to vector<8x4xf32>
    %129 = arith.subf %99, %128 : vector<8x4xf32>
    %130 = arith.mulf %118, %129 : vector<8x4xf32>
    %cst_71 = arith.constant dense<0.000000e+00> : vector<8xf32>
    %131 = vector.multi_reduction <add>, %130, %cst_71 [1] : vector<8x4xf32> to vector<8xf32>
    %132 = vector.shape_cast %131 : vector<8xf32> to vector<8x1xf32>
    %133 = arith.mulf %102, %104 : vector<8x4xf32>
    %134 = arith.addf %100, %133 : vector<8x4xf32>
    %cst_72 = arith.constant -5.000000e-01 : f32
    %135 = vector.broadcast %cst_72 : f32 to vector<8x4xf32>
    %136 = arith.mulf %135, %104 : vector<8x4xf32>
    %137 = arith.mulf %136, %104 : vector<8x4xf32>
    %138 = arith.subf %137, %101 : vector<8x4xf32>
    %cst_73 = arith.constant 0.918938517 : f32
    %139 = vector.broadcast %cst_73 : f32 to vector<8x4xf32>
    %140 = arith.subf %138, %139 : vector<8x4xf32>
    %c3_i32 = arith.constant 3 : i32
    %141 = vector.broadcast %c3_i32 : i32 to vector<8x4xi32>
    %142 = arith.cmpi slt, %108, %141 : vector<8x4xi32>
    %143 = arith.extui %142 : vector<8x4xi1> to vector<8x4xi32>
    %144 = arith.sitofp %143 : vector<8x4xi32> to vector<8x4xf32>
    %145 = arith.mulf %134, %144 : vector<8x4xf32>
    %146 = arith.mulf %145, %118 : vector<8x4xf32>
    %cst_74 = arith.constant dense<0.000000e+00> : vector<8xf32>
    %147 = vector.multi_reduction <add>, %146, %cst_74 [1] : vector<8x4xf32> to vector<8xf32>
    %148 = vector.shape_cast %147 : vector<8xf32> to vector<8x1xf32>
    %cst_75 = arith.constant 1.000000e+00 : f32
    %149 = vector.broadcast %cst_75 : f32 to vector<8x1xf32>
    %150 = arith.mulf %148, %149 : vector<8x1xf32>
    %151 = arith.mulf %140, %144 : vector<8x4xf32>
    %152 = arith.mulf %151, %118 : vector<8x4xf32>
    %cst_76 = arith.constant dense<0.000000e+00> : vector<8xf32>
    %153 = vector.multi_reduction <add>, %152, %cst_76 [1] : vector<8x4xf32> to vector<8xf32>
    %154 = vector.shape_cast %153 : vector<8xf32> to vector<8x1xf32>
    %155 = arith.addf %132, %154 : vector<8x1xf32>
    %156 = tpu.iota {dimensions = array<i32: 1>} : vector<8x128xi32>
    %157 = vector.broadcast %114 : vector<8x1xi32> to vector<8x128xi32>
    %158 = arith.cmpi eq, %156, %157 : vector<8x128xi32>
    %159 = arith.extui %158 : vector<8x128xi1> to vector<8x128xi32>
    %160 = arith.sitofp %159 : vector<8x128xi32> to vector<8x128xf32>
    %c4_i32_77 = arith.constant 4 : i32
    %161 = vector.broadcast %c4_i32_77 : i32 to vector<8x128xi32>
    %162 = arith.cmpi eq, %156, %161 : vector<8x128xi32>
    %163 = vector.shape_cast %150 : vector<8x1xf32> to vector<8x1xf32>
    %164 = vector.broadcast %163 : vector<8x1xf32> to vector<8x128xf32>
    %165 = arith.select %162, %164, %160 : vector<8x128xi1>, vector<8x128xf32>
    %c5_i32 = arith.constant 5 : i32
    %166 = vector.broadcast %c5_i32 : i32 to vector<8x128xi32>
    %167 = arith.cmpi eq, %156, %166 : vector<8x128xi32>
    %168 = vector.shape_cast %155 : vector<8x1xf32> to vector<8x1xf32>
    %169 = vector.broadcast %168 : vector<8x1xf32> to vector<8x128xf32>
    %170 = arith.select %167, %169, %165 : vector<8x128xi1>, vector<8x128xf32>
    %c0_78 = arith.constant 0 : index
    %c0_79 = arith.constant 0 : index
    %171 = vector.load %arg9[%c0_78, %c0_79] : memref<8x128xf32, #tpu.memory_space<vmem>>, vector<8x128xf32>
    tpu.vector_store %arg9[%c0_78, %c0_79], %170 {strides = array<i32>} : memref<8x128xf32, #tpu.memory_space<vmem>>, vector<8x128xf32>,
    return
  }
  func.func @transform_0(%arg0: i32) -> (i32, i32) {
    %c0_i32 = arith.constant 0 : i32
    %c0_i32_0 = arith.constant 0 : i32
    return %arg0, %c0_i32 : i32, i32
  }
  func.func @transform_1(%arg0: i32) -> (i32, i32) {
    %c0_i32 = arith.constant 0 : i32
    %c0_i32_0 = arith.constant 0 : i32
    return %arg0, %c0_i32 : i32, i32
  }
  func.func @transform_2(%arg0: i32) -> (i32, i32) {
    %c0_i32 = arith.constant 0 : i32
    %c0_i32_0 = arith.constant 0 : i32
    return %arg0, %c0_i32 : i32, i32
  }
  func.func @transform_3(%arg0: i32) -> (i32, i32) {
    %c0_i32 = arith.constant 0 : i32
    %c0_i32_0 = arith.constant 0 : i32
    return %arg0, %c0_i32 : i32, i32
  }
  func.func @transform_4(%arg0: i32) -> (i32, i32, i32) {
    %c0_i32 = arith.constant 0 : i32
    %c0_i32_0 = arith.constant 0 : i32
    %c0_i32_1 = arith.constant 0 : i32
    %c0_i32_2 = arith.constant 0 : i32
    return %c0_i32, %c0_i32_0, %c0_i32_1 : i32, i32, i32
  }
  func.func @transform_5(%arg0: i32) -> (i32, i32, i32) {
    %c0_i32 = arith.constant 0 : i32
    %c0_i32_0 = arith.constant 0 : i32
    %c0_i32_1 = arith.constant 0 : i32
    %c0_i32_2 = arith.constant 0 : i32
    return %c0_i32, %c0_i32_0, %c0_i32_1 : i32, i32, i32
  }
  func.func @transform_6(%arg0: i32) -> (i32, i32) {
    %c0_i32 = arith.constant 0 : i32
    %c0_i32_0 = arith.constant 0 : i32
    %c0_i32_1 = arith.constant 0 : i32
    return %c0_i32, %c0_i32_0 : i32, i32
  }
  func.func @transform_7(%arg0: i32) -> (i32, i32) {
    %c0_i32 = arith.constant 0 : i32
    %c0_i32_0 = arith.constant 0 : i32
    %c0_i32_1 = arith.constant 0 : i32
    return %c0_i32, %c0_i32_0 : i32, i32
  }
  func.func @transform_8(%arg0: i32) -> (i32, i32) {
    %c0_i32 = arith.constant 0 : i32
    %c0_i32_0 = arith.constant 0 : i32
    return %arg0, %c0_i32 : i32, i32
  }
}

</mosaic_0001>

<bundles_post_ra>
// kernel: tpu_custom_call.1
= control target key start
LH: loop header
LB: loop body
LE: loop exit
PB: predicated region body
PF: predicated region fallthrough
CT: control target
= control target key end

     0   :  { %s1791_s0 = inlined_call_operand.vmem [shape: f32[16,16], index: 0, kind: input, shape index: {}]   ;;  %s1792_s1 = inlined_call_operand.hbm [shape: f32[16,32], index: 1, kind: input, shape index: {}]   ;;  %s1793_s2 = inlined_call_operand.vmem [shape: f32[16,4], index: 2, kind: input, shape index: {}]   ;;  %s1794_s3 = inlined_call_operand.vmem [shape: f32[16,4], index: 3, kind: input, shape index: {}]   ;;  %s1795_s4 = inlined_call_operand.vmem [shape: bf16[3,16,32], index: 4, kind: input, shape index: {}]   ;;  %s1796_s5 = inlined_call_operand.hbm [shape: bf16[9,32,32], index: 5, kind: input, shape index: {}]   ;;  %s1797_s6 = inlined_call_operand.vmem [shape: bf16[32,12], index: 6, kind: input, shape index: {}]   ;;  %s1798_s7 = inlined_call_operand.vmem [shape: f32[7,32], index: 7, kind: input, shape index: {}]   ;;  %s1799_s8 = inlined_call_operand.hbm [shape: f32[16,128], index: 8, kind: output, shape index: {}]  }
   0x1   :  { %1800 = sst [smem:[#allocation12_spill]] %s1796_s5 }
   0x2   :  { %13 = vsyncpa [#allocation3], 0 }
   0x3   :  { %15 = vsyncpa [#allocation3 + $0x1], 0 }
   0x4   :  { %16 = vsyncpa [#allocation6], 0 }
   0x5   :  { %17 = vsyncpa [#allocation4], 0 }
   0x6   :  { %19 = vsyncpa [#allocation4 + $0x1], 0  ;;  %s1555_s27 = smov 0   ;;  %s1557_s28 = smov 0  }
   0x7   :  { %s1559_s29 = smov 0   ;;  %s1561_s30 = smov 0  }
   0x8 LB: > { %s1801_s5 = sld [smem:[#allocation12_spill]]  ;;  %s1579_s12 = sadd.s32 4294967295, %s1500_s30   ;;  %s1500_s30 = sphi %s1561_s30, %s1813_s30   ;;  %s1496_s29 = sphi %s1559_s29, %s1812_s29   ;;  %s1492_s28 = sphi %s1557_s28, %s1811_s28   ;;  %s1488_s27 = sphi %s1555_s27, %s1810_s27  }
   0x9   : > { %p1109_p0 = scmp.ge.s32.totalorder %s1500_s30, 1  ;;  %p72_p1 = scmp.eq.s32.totalorder %s1579_s12, 0 }
   0xa   : > { %p244_p2 = scmp.lt.s32.totalorder %s1500_s30, 3  ;;  %s1502_s14 = smov [#allocation5]  }
   0xb   : > { %s260_s15 = sshll.u32 %s1502_s14, 4  ;;  %s1503_s16 = smov 64   ;;  %s261_s15 = int_to_ptr.vmem [resolvable:$true] %s260_s15 }
   0xc   : > { %p1584_p3 = pnand %p1109_p0, %p244_p2  ;;  %s1504_s17 = smov 4  }
   0xd   : > { %s1108_s18 = sadd.s32 4294967294, %s1500_s30   ;;  %s1595_s19 = sadd.s32 1, %s1500_s30  }
   0xe   : > { %s258_s11 = sshll.u32 %s1801_s5, 4  ;;  %p1272_p4 = pneg %p1584_p3  ;;  %s259_s11 = int_to_ptr.hbm [resolvable:$true] %s258_s11 }
   0xf   : > { %s58_s20 = sadd.s32 1, %s1496_s29  ;;  %s55_s21 = ssub.s32 %s1500_s30, %s1595_s19 }
  0x10   : > { %p1273_p6 = pnand %p1272_p4, %p72_p1  ;;  %p65_p7 = scmp.ne.s32.totalorder %s1496_s29, %s1492_s28 }
  0x11   : > { %p56_p8 = scmp.eq.s32.totalorder %s55_s21, 0  ;;  %p66_p9 = scmp.eq.s32.totalorder %s1500_s30, 0 }
  0x12   : > { %1275 = dma.hbm_to_vmem [thread:$0]  (!%p1273_p6), %s259_s11, 2304, %s261_s15, [#allocation6], %s1503_s16, %s1503_s16, %s1504_s17  }
  0x13   : > { %p71_p10 = scmp.ne.s32.totalorder %s1492_s28, %s1488_s27  ;;  %p231_p11 = scmp.eq.s32.totalorder %s1579_s12, 1 }
  0x14   : > { %s1607_s22 = scalar_select %p56_p8, %s1496_s29, %s58_s20  }
  0x15   : > { %p1611_p12 = por %p72_p1, %p71_p10  ;;  %p1615_p13 = por %p231_p11, %p65_p7 }
  0x16   : > { %1803 = sst [smem:[#allocation11_spill]] %s1607_s22  ;;  %p237_p0 = scmp.eq.s32.totalorder %s1108_s18, 1 }
  0x17   : > { %p67_p2 = por %p66_p9, %p65_p7  ;;  %s287_s25 = sand.u32 1, %s1496_s29  }
  0x18   : > { %p1620_p4 = por %p237_p0, %p71_p10  ;;  %p1285_p6 = scmp.lt.s32.totalorder %s1500_s30, 2 }
  0x19   : > { %s1112_s9 = sshll.u32 %s287_s25, 3  ;;  %s1113_s10 = sshll.u32 %s1500_s30, 3 }
  0x1a   : > { %s295_s15 = scalar_lea.hbm %s1792_s1, %s1113_s10  ;;  %s291_s17 = scalar_lea.vmem [#allocation2], %s1112_s9 }
  0x1b   : > { %s297_s16 = sshll.u32 %s295_s15, 4  ;;  %s299_s20 = sshll.u32 %s291_s17, 4  ;;  %s298_s16 = int_to_ptr.hbm [resolvable:$true] %s297_s16  ;;  %s300_s20 = int_to_ptr.vmem [resolvable:$true] %s299_s20 }
  0x1c   : > { %p1629_p8 = pnand %p1285_p6, %p67_p2  ;;  %s288_s21 = scalar_lea.sflag [#allocation3], %s287_s25 }
  0x1d   : > { %s1400_s5 = sshra.s32 %s298_s16, 4  ;;  %s1407_s9 = scalar_lea.hbm %s1792_s1, 16  ;;  %s1401_s5 = int_to_ptr.hbm [resolvable:$true] %s1400_s5 }
  0x1e   : > { %s1402_s22 = scalar_lea.hbm %s1401_s5, 8  ;;  %p1404_p9 = pneg %p1629_p8 }
  0x1f   : > { %p1403_p7 = scmp.ne.s32.totalorder %s1401_s5, %s1402_s22  ;;  %p1408_p0 = scmp.lt.s32.totalorder %s1401_s5, %s1792_s1 }
  0x20   : > { %p1409_p2 = scmp.lt.s32.totalorder %s1407_s9, %s1402_s22 }
  0x21   : > { %p1405_p10 = pnand %p1404_p9, %p1403_p7 }
  0x22   : > { %p1410_p6 = por %p1409_p2, %p1408_p0 }
  0x23   : > { %p1406_p11 = pneg %p1405_p10 }
  0x25   : > { %p1411_p5 = pnand %p1410_p6, %p1406_p11 }
  0x27   : > { %1414 = shalt.err (!%p1411_p5)
}
  0x28   : > { %1279 = dma.hbm_to_vmem [thread:$0]  (!%p1629_p8), %s298_s16, 128, %s300_s20, %s288_s21  }
  0x29   : > { %322 = sbr.rel (%p1584_p3) target bundleno = 1280 (0x500), region = 52  ;;  %s1646_s25 = sand.u32 (!%p1584_p3), 1, %s1492_s28  }
  0x2a   : > { %s1115_s17 = sshll.u32 (!%p1584_p3), %s1646_s25, 3  ;;  %s325_s10 = scalar_lea.sflag (!%p1584_p3), [#allocation3], %s1646_s25 }
  0x2b   : > { %s328_s5 = scalar_lea.vmem (!%p1584_p3), [#allocation2], %s1115_s17 }
  0x2e   : > { %1475 = dma.done.wait (%p1611_p12), %s325_s10, 128  }
  0x2f   : > { %1477 = vsyncadd (%p1611_p12), %s325_s10, 4294967168 }
  0x30   : > { %1479 = dma.done.wait (%p72_p1), [#allocation6], 2304  }
  0x31   : > { %1481 = vsyncadd (%p72_p1), [#allocation6], 4294964992  ;;  %p379_p3 = scmp.lt.s32.totalorder %s1579_s12, 1  ;;  %v1243_v0 = vld [vmem:[#allocation5 + $0x8] sm:$0xff]  ;;  %v1241_v1 = vld [vmem:[%s1795_s4] sm:$0xff]  ;;  %vm437_vm0 = vcmask 130048  }
  0x32   : > { %v1246_v2 = vld [vmem:[#allocation5 + $0x18] sm:$0xff]  ;;  %v1247_v5 = vld [vmem:[%s1795_s4 + $0x10] sm:$0xff]  ;;  %424 = vmatpush.bf16.msra.mxu0 %v1243_v0  ;;  %448 = vmatpush.bf16.msra.mxu1 %v1241_v1  ;;  %v1245_v9 = vld [vmem:[#allocation5 + $0x10] sm:$0xff]  ;;  %vm414_vm1 = vcmask 261120   ;;  %s1505_s10 = smov 8   ;;  %s1238_s16 = sshll.u32 %s1579_s12, 3 }
  0x33   : > { %s380_s13 = scalar_select %p379_p3, %s1579_s12, 1  ;;  %v1244_v3 = vld [vmem:[%s1795_s4 + $0x8] sm:$0xff]  ;;  %v1242_v7 = vld [vmem:[#allocation5] sm:$0xff]  ;;  %502 = vmatpush.bf16.msra.mxu2 %v1246_v2  ;;  %v1249_v10 = vld [vmem:[#allocation5 + $0x28] sm:$0xff] }
  0x34   : > { %v394_v8 = vld [vmem:[%s328_s5] sm:$0xff]  ;;  %522 = vmatpush.bf16.msra.mxu3 %v1244_v3  ;;  %v1248_v12 = vld [vmem:[#allocation5 + $0x20] sm:$0xff]  ;;  %v1253_v27 = vld [vmem:[#allocation5 + $0x68] sm:$0xff]  ;;  %s1506_s5 = smov 120   ;;  %s987_s23 = scalar_lea.hbm %s1799_s8, %s1238_s16 }
  0x35   : > { %s1662_s22 = sshll.u32 %s380_s13, 3  ;;  %v1678_v11 = vpack.c.bf16 %v394_v8, %v394_v8  ;;  %v1333_v14 = vld [vmem:[%s1798_s7] ss:$0 sm:$0xff]  ;;  %v1251_v26 = vld [vmem:[#allocation5 + $0x38] sm:$0xff]  ;;  %v1255_v29 = vld [vmem:[#allocation5 + $0x48] sm:$0xff]  ;;  %s1509_s13 = smov 124  }
  0x36   : > { %s382_s18 = scalar_lea.vmem %s1791_s0, %s1662_s22  ;;  %425 = vmatpush.bf16.msra.mxu0 %v1242_v7  ;;  %558 = vmatpush.bf16.msrb.mxu1 %v1249_v10  ;;  %v1250_v31 = vld [vmem:[#allocation5 + $0x30] sm:$0xff]  ;;  %v1252_v32 = vld [vmem:[#allocation5 + $0x60] sm:$0xff]  ;;  %v1257_v33 = vld [vmem:[#allocation5 + $0x78] sm:$0xff]  ;;  %s386_s11 = scalar_lea.vmem %s1793_s2, %s1662_s22 }
  0x37   : > { %v392_v4 = vld [vmem:[%s382_s18] sm:$0xff]  ;;  %503 = vmatpush.bf16.msra.mxu2 %v1245_v9  ;;  %v1254_v34 = vld [vmem:[#allocation5 + $0x40] sm:$0xff]  ;;  %v1259_v44 = vld [vmem:[#allocation5 + $0x58] sm:$0xff]  ;;  %s390_s15 = scalar_lea.vmem %s1794_s3, %s1662_s22  ;;  %s1508_s22 = smov 4  }
  0x38   : > { %v393_v6 = vpack.c.bf16 %v392_v4, %v392_v4  ;;  %578 = vmatpush.bf16.msrb.mxu3 %v1247_v5  ;;  %v1335_v35 = vld [vmem:[%s1798_s7 + $0x2] ss:$0 sm:$0xff]  ;;  %v1261_v46 = vld [vmem:[#allocation5 + $0x88] sm:$0xff]  ;;  %v1334_v48 = vld [vmem:[%s1798_s7 + $0x1] ss:$0 sm:$0xff]  ;;  %s378_s21 = scalar_lea.vmem [#allocation7], %s1115_s17 }
  0x39   : > { %1129 = vmatmul.msk.bf16.vlgmr.msra.gmra.mxu0 %vm414_vm1, %v1678_v11  ;;  %v1256_v45 = vld [vmem:[#allocation5 + $0x70] sm:$0xff]  ;;  %v1260_v52 = vld [vmem:[#allocation5 + $0x80] sm:$0xff]  ;;  %s991_s9 = sshll.u32 %s987_s23, 4  ;;  %s977_s12 = scalar_lea.sflag [#allocation4], %s1646_s25  ;;  %s992_s9 = int_to_ptr.hbm [resolvable:$true] %s991_s9 }
  0x3a   : > { %1134 = vmatmul.msk.bf16.vlgmr.msra.gmra.mxu1 %vm437_vm0, %v393_v6  ;;  %1151 = vmatmul.msk.bf16.vlgmr.msra.gmra.mxu3 %vm437_vm0, %v393_v6  ;;  %v1258_v50 = vld [vmem:[#allocation5 + $0x50] sm:$0xff]  ;;  %s1444_s14 = sshra.s32 %s992_s9, 4  ;;  %s1445_s14 = int_to_ptr.hbm [resolvable:$true] %s1444_s14 }
  0x3b   : > { %1146 = vmatmul.msk.bf16.vlgmr.msra.gmra.mxu2 %vm414_vm1, %v1678_v11  ;;  %559 = vmatpush.bf16.msrb.mxu1 %v1248_v12  ;;  %p1451_p8 = scmp.lt.s32.totalorder %s1445_s14, %s1799_s8 }
  0x3c   : > { %666 = vmatpush.bf16.msrb.mxu2 %v1251_v26  ;;  %638 = vmatpush.bf16.msrb.mxu0 %v1253_v27  ;;  %v1263_v27 = vld [vmem:[%s1797_s6 + $0x8] sm:$0xff] }
  0x3d   : > { %748 = vmatpush.bf16.msra.mxu3 %v1255_v29  ;;  %v1262_v29 = vld [vmem:[%s1797_s6] sm:$0xff] }
  0x3f   : > { %723 = vmatpush.bf16.msra.mxu1 %v1257_v33 }
  0x40   : > { %667 = vmatpush.bf16.msrb.mxu2 %v1250_v31  ;;  %639 = vmatpush.bf16.msrb.mxu0 %v1252_v32  ;;  %v1338_v31 = vld [vmem:[%s1798_s7 + $0x5] ss:$0 sm:$0xff] }
  0x41   : > { %749 = vmatpush.bf16.msra.mxu3 %v1254_v34 }
  0x43   : > { %724 = vmatpush.bf16.msra.mxu1 %v1256_v45 }
  0x44   : > { %812 = vmatpush.bf16.msra.mxu2 %v1259_v44  ;;  %787 = vmatpush.bf16.msra.mxu0 %v1261_v46 }
  0x48   : > { %813 = vmatpush.bf16.msra.mxu2 %v1258_v50  ;;  %788 = vmatpush.bf16.msra.mxu0 %v1260_v52 }
  0x49   : > { %1177 = vmatmul.msk.bf16.vlgmr.msrb.gmra.mxu0 %vm414_vm1, %v1678_v11 }
  0x4a   : > { %1162 = vmatmul.msk.bf16.vlgmr.msrb.gmra.mxu1 %vm414_vm1, %v1678_v11  ;;  %1167 = vmatmul.msk.bf16.vlgmr.msrb.gmra.mxu3 %vm437_vm0, %v393_v6 }
  0x4b   : > { %872 = vmatpush.bf16.msrb.mxu1 %v1263_v27 }
  0x4f   : > { %873 = vmatpush.bf16.msrb.mxu1 %v1262_v29 }
  0x59   : > { %1214 = vmatmul.msk.bf16.vlgmr.msra.gmra.mxu0 %vm414_vm1, %v1678_v11 }
  0x5a   : > { %1196 = vmatmul.msk.bf16.vlgmr.msra.gmra.mxu1 %vm414_vm1, %v1678_v11 }
  0xb6   : > { %v427_v15 = vpop.f32.mrf.mxu0 }
  0xb7   : > { %v450_v13 = vpop.f32.mrf.mxu1 }
  0xb8   : > { %v451_v16 = vadd.f32 %v450_v13, %v427_v15 }
  0xba   : > { %v456_v17 = vadd.f32 %v1333_v14, %v451_v16 }
  0xbc   : > { %v1135_v20 = vmul.f32 -1.442695, %v456_v17 }
  0xbd   : > { %v524_v18 = vpop.f32.mrf.mxu3 }
  0xbe   : > { %1340 = vpow2.f32 %v1135_v20  ;;  %v505_v21 = vpop.f32.mrf.mxu2  ;;  %v429_v22 = vpop.f32.mrf.mxu0 }
  0xbf   : > { %v452_v19 = vpop.f32.mrf.mxu1  ;;  %v525_v47 = vadd.f32 %v524_v18, %v505_v21 }
  0xc0   : > { %v1336_v19 = vld [vmem:[%s1798_s7 + $0x3] ss:$0 sm:$0xff] }
  0xc1   : > { %v530_v53 = vadd.f32 %v1334_v48, %v525_v47 }
  0xc4   : > { %v1341_v25 = vpop.eup %1340 }
  0xc5   : > { %v526_v23 = vpop.f32.mrf.mxu3  ;;  %v460_v28 = vadd.f32 1.0, %v1341_v25 }
  0xc6   : > { %v507_v30 = vpop.f32.mrf.mxu2  ;;  %v641_v13 = vpop.f32.mrf.mxu0 }
  0xc7   : > { %v561_v24 = vpop.f32.mrf.mxu1  ;;  %1342 = vrcp.f32 %v460_v28  ;;  %v472_v56 = vand.u32 2147483648, %v460_v28  ;;  %vm466_vm3 = vweird.f32 %v460_v28  ;;  %v470_v58 = vand.u32 2147483647, %v460_v28 }
  0xc9   : > { %v473_v60 = vor.u32 1.1754944e-38, %v472_v56  ;;  %vm471_vm5 = vcmp.eq.f32.partialorder %v470_v58, 8.507059e+37 }
  0xcd   : > { %v580_v36 = vpop.f32.mrf.mxu3  ;;  %v1343_v39 = vpop.eup %1342 }
  0xce   : > { %v581_v37 = vadd.f32 %v580_v36, %v561_v24  ;;  %v462_v41 = vmul.f32 %v1343_v39, %v460_v28  ;;  %vm467_vm2 = vweird.f32 %v1343_v39  ;;  %v643_v14 = vpop.f32.mrf.mxu0 }
  0xcf   : > { %v563_v38 = vpop.f32.mrf.mxu1  ;;  %vm468_vm4 = vmor %vm466_vm3, %vm467_vm2  ;;  %vm884_vm3 = vcmask 31744  }
  0xd0   : > { %v586_v40 = vadd.f32 %v1335_v35, %v581_v37  ;;  %v463_v43 = vsub.f32 1.0, %v462_v41 }
  0xd2   : > { %v1168_v42 = vmul.f32 -1.442695, %v586_v40  ;;  %v464_v51 = vmul.f32 %v1343_v39, %v463_v43 }
  0xd4   : > { %1344 = vpow2.f32 %v1168_v42  ;;  %v465_v55 = vadd.f32 %v1343_v39, %v464_v51 }
  0xd5   : > { %v582_v49 = vpop.f32.mrf.mxu3  ;;  %1346 = vtanh.f32 %v530_v53 }
  0xd6   : > { %v469_v59 = vsel %vm468_vm4, %v1343_v39, %v465_v55  ;;  %v790_v16 = vpop.f32.mrf.mxu0  ;;  %v1337_v39 = vld [vmem:[%s1798_s7 + $0x4] ss:$0 sm:$0xff] }
  0xd7   : > { %v474_v61 = vsel %vm471_vm5, %v473_v60, %v469_v59  ;;  %v726_v15 = vpop.f32.mrf.mxu1 }
  0xda   : > { %v1345_v54 = vpop.eup %1344 }
  0xdb   : > { %v590_v57 = vadd.f32 1.0, %v1345_v54  ;;  %v1347_v62 = vpop.eup %1346 }
  0xdc   : > { %v606_v0 = vmul.f32 %v1347_v62, %v474_v61 }
  0xdd   : > { %1348 = vrcp.f32 %v590_v57  ;;  %v602_v3 = vand.u32 2147483648, %v590_v57  ;;  %v600_v5 = vand.u32 2147483647, %v590_v57  ;;  %vm596_vm7 = vweird.f32 %v590_v57 }
  0xde   : > { %1350 = vtanh.f32 %v606_v0  ;;  %v792_v18 = vpop.f32.mrf.mxu0 }
  0xdf   : > { %v603_v7 = vor.u32 1.1754944e-38, %v602_v3  ;;  %vm601_vm9 = vcmp.eq.f32.partialorder %v600_v5, 8.507059e+37  ;;  %v728_v17 = vpop.f32.mrf.mxu1  ;;  %v1339_v3 = vld [vmem:[%s1798_s7 + $0x6] ss:$0 sm:$0xff] }
  0xe0   : > { %v881_v5 = vld [vmem:[%s386_s11] sm:$0xff]  ;;  %s989_s11 = sshll.u32 %s378_s21, 4  ;;  %s990_s11 = int_to_ptr.vmem [resolvable:$true] %s989_s11 }
  0xe3   : > { %v1349_v63 = vpop.eup %1348 }
  0xe4   : > { %v592_v1 = vmul.f32 %v1349_v63, %v590_v57  ;;  %vm597_vm6 = vweird.f32 %v1349_v63  ;;  %v1351_v9 = vpop.eup %1350 }
  0xe5   : > { %vm598_vm8 = vmor %vm596_vm7, %vm597_vm6 }
  0xe6   : > { %v593_v2 = vsub.f32 1.0, %v592_v1 }
  0xe8   : > { %v594_v4 = vmul.f32 %v1349_v63, %v593_v2 }
  0xea   : > { %v595_v6 = vadd.f32 %v1349_v63, %v594_v4 }
  0xec   : > { %v599_v8 = vsel %vm598_vm8, %v1349_v63, %v595_v6 }
  0xed   : > { %v604_v10 = vsel %vm601_vm9, %v603_v7, %v599_v8 }
  0xee   : > { %v608_v11 = vmul.f32 %v1351_v9, %v604_v10 }
  0xf0   : > { %v609_v12 = vpack.c.bf16 %v608_v11, %v608_v11  ;;  %v888_v11 = vlaneseq }
  0xf2   : > { %1186 = vmatmul.msk.bf16.vlgmr.msrb.gmra.mxu2 %vm414_vm1, %v609_v12  ;;  %1205 = vmatmul.msk.bf16.vlgmr.msra.gmra.mxu3 %vm414_vm1, %v609_v12 }
 0x102   : > { %1223 = vmatmul.msk.bf16.vlgmr.msra.gmra.mxu2 %vm414_vm1, %v609_v12  ;;  %v1735_v12 = vand.u32 127, %v888_v11 }
 0x104   : > { %vm945_vm5 = vcmp.lt.s32.totalorder %v1735_v12, 3  ;;  %vm971_vm7 = vcmp.eq.s32.totalorder %v1735_v12, 4  ;;  %vm973_vm8 = vcmp.eq.s32.totalorder %v1735_v12, 5 }
 0x175   : > { %v669_v20 = vpop.f32.mrf.mxu2  ;;  %v751_v21 = vpop.f32.mrf.mxu3 }
 0x176   : > { %v670_v22 = vadd.f32 %v669_v20, %v641_v13  ;;  %v752_v38 = vadd.f32 %v751_v21, %v726_v15 }
 0x178   : > { %v675_v23 = vadd.f32 %v1336_v19, %v670_v22  ;;  %v757_v43 = vadd.f32 %v1337_v39, %v752_v38  ;;  %v882_v22 = vld [vmem:[%s390_s15] sm:$0xff]  ;;  %s1446_s15 = scalar_lea.hbm %s1445_s14, 8 }
 0x179   : > { %p1447_p1 = scmp.ne.s32.totalorder %s1445_s14, %s1446_s15 }
 0x17a   : > { %v1187_v24 = vmul.f32 -1.442695, %v675_v23 }
 0x17b   : > { %p1448_p5 = pnand %p1447_p1, %p1615_p13 }
 0x17c   : > { %1352 = vpow2.f32 %v1187_v24 }
 0x17d   : > { %v671_v25 = vpop.f32.mrf.mxu2  ;;  %v753_v26 = vpop.f32.mrf.mxu3  ;;  %p1449_p12 = pneg %p1448_p5 }
 0x182   : > { %v1353_v28 = vpop.eup %1352 }
 0x183   : > { %v679_v30 = vadd.f32 1.0, %v1353_v28  ;;  %v1507_v28 = vmov 0.0  }
 0x184   : > { %v1236_v29 = vsel %vm945_vm5, 1.0, %v1507_v28 }
 0x185   : > { %1354 = vrcp.f32 %v679_v30  ;;  %v815_v32 = vpop.f32.mrf.mxu2  ;;  %v691_v46 = vand.u32 2147483648, %v679_v30  ;;  %vm685_vm11 = vweird.f32 %v679_v30  ;;  %v689_v47 = vand.u32 2147483647, %v679_v30 }
 0x186   : > { %v816_v33 = vadd.f32 %v815_v32, %v790_v16 }
 0x187   : > { %v692_v50 = vor.u32 1.1754944e-38, %v691_v46  ;;  %vm690_vm13 = vcmp.eq.f32.partialorder %v689_v47, 8.507059e+37 }
 0x188   : > { %v821_v34 = vadd.f32 %v1338_v31, %v816_v33 }
 0x18a   : > { %v1224_v35 = vmul.f32 -1.442695, %v821_v34 }
 0x18b   : > { %v1355_v36 = vpop.eup %1354 }
 0x18c   : > { %v681_v37 = vmul.f32 %v1355_v36, %v679_v30  ;;  %1356 = vpow2.f32 %v1224_v35  ;;  %vm686_vm10 = vweird.f32 %v1355_v36 }
 0x18d   : > { %v817_v40 = vpop.f32.mrf.mxu2  ;;  %vm687_vm12 = vmor %vm685_vm11, %vm686_vm10  ;;  %1358 = vtanh.f32 %v757_v43 }
 0x18e   : > { %v682_v41 = vsub.f32 1.0, %v681_v37 }
 0x190   : > { %v683_v42 = vmul.f32 %v1355_v36, %v682_v41 }
 0x192   : > { %v1357_v44 = vpop.eup %1356  ;;  %v684_v45 = vadd.f32 %v1355_v36, %v683_v42 }
 0x193   : > { %v825_v48 = vadd.f32 1.0, %v1357_v44  ;;  %v1359_v52 = vpop.eup %1358 }
 0x194   : > { %v688_v49 = vsel %vm687_vm12, %v1355_v36, %v684_v45 }
 0x195   : > { %1360 = vrcp.f32 %v825_v48  ;;  %v693_v51 = vsel %vm690_vm13, %v692_v50, %v688_v49  ;;  %v837_v57 = vand.u32 2147483648, %v825_v48  ;;  %v835_v59 = vand.u32 2147483647, %v825_v48 }
 0x196   : > { %v841_v54 = vmul.f32 %v1359_v52, %v693_v51  ;;  %vm831_vm15 = vweird.f32 %v825_v48 }
 0x197   : > { %v838_v61 = vor.u32 1.1754944e-38, %v837_v57  ;;  %vm836_vm2 = vcmp.eq.f32.partialorder %v835_v59, 8.507059e+37 }
 0x198   : > { %1362 = vtanh.f32 %v841_v54 }
 0x19b   : > { %v1361_v53 = vpop.eup %1360 }
 0x19c   : > { %v827_v55 = vmul.f32 %v1361_v53, %v825_v48  ;;  %vm832_vm14 = vweird.f32 %v1361_v53  ;;  %v937_v48 = vmul.f32 -0.5, %v882_v22 }
 0x19d   : > { %vm833_vm0 = vmor %vm831_vm15, %vm832_vm14 }
 0x19e   : > { %v828_v56 = vsub.f32 1.0, %v827_v55  ;;  %v1363_v63 = vpop.eup %1362  ;;  %v938_v49 = vmul.f32 %v937_v48, %v882_v22 }
 0x1a0   : > { %v829_v58 = vmul.f32 %v1361_v53, %v828_v56 }
 0x1a2   : > { %v830_v60 = vadd.f32 %v1361_v53, %v829_v58 }
 0x1a4   : > { %v834_v62 = vsel %vm833_vm0, %v1361_v53, %v830_v60 }
 0x1a5   : > { %v839_v0 = vsel %vm836_vm2, %v838_v61, %v834_v62 }
 0x1a6   : > { %v843_v1 = vmul.f32 %v1363_v63, %v839_v0 }
 0x1a8   : > { %v844_v2 = vpack.c.bf16 %v843_v1, %v843_v1 }
 0x1aa   : > { %1233 = vmatmul.msk.bf16.vlgmr.msrb.gmra.mxu1 %vm414_vm1, %v844_v2 }
 0x227   : > { %v875_v4 = vpop.f32.mrf.mxu1 }
 0x228   : > { %v1729_v6 = vadd.f32 %v1339_v3, %v875_v4 }
 0x22a   : > { %v910_v7 = vsel %vm884_vm3, %v1729_v6, -inf  ;;  %v883_v8 = vadd.f32 %v881_v5, %v1729_v6  ;;  %v879_v32 = vmul.f32 1.442695, %v1729_v6 }
 0x22b   : > { %911 = vmax.xlane.f32.xlu2 %v910_v7 }
 0x22c   : > { %v885_v9 = vsel %vm884_vm3, %v883_v8, -inf  ;;  %1364 = vpow2.f32 %v879_v32 }
 0x22d   : > { %886 = vmax.xlane.f32.xlu0 %v885_v9 }
 0x22f   : > { %v877_v10 = vpop.f32.mrf.mxu1 }
 0x232   : > { %v1365_v33 = vpop.eup %1364 }
 0x29e   : > { %v912_v36 = vpop.xlane.xlu2 %911 }
 0x29f   : > { %v913_v37 = vsub.f32 %v1729_v6, %v912_v36 }
 0x2a0   : > { %v887_v13 = vpop.xlane.xlu0 %886 }
 0x2a1   : > { %vm890_vm1 = vcmp.eq.f32.partialorder %v883_v8, %v887_v13  ;;  %v914_v38 = vmul.f32 1.442695, %v913_v37 }
 0x2a2   : > { %v891_v14 = vsel %vm890_vm1, %v1735_v12, 4 }
 0x2a3   : > { %v892_v15 = vsel %vm884_vm3, %v891_v14, 2147483647  ;;  %1366 = vpow2.f32 %v914_v38 }
 0x2a4   : > { %v894_v16 = vshra.s32 %v892_v15, 16  ;;  %v893_v18 = vand.u32 65535, %v892_v15 }
 0x2a6   : > { %v896_v17 = vcvt.s32.f32 %v894_v16  ;;  %v895_v20 = vcvt.s32.f32 %v893_v18 }
 0x2a8   : > { %897 = vmin.xlane.f32.xlu0 %v896_v17 }
 0x2a9   : > { %v1367_v39 = vpop.eup %1366 }
 0x2aa   : > { %v916_v40 = vsel %vm884_vm3, %v1367_v39, 0.0 }
 0x31b   : > { %v898_v19 = vpop.xlane.xlu0 %897 }
 0x31c   : > { %vm899_vm4 = vcmp.eq.f32.partialorder %v896_v17, %v898_v19  ;;  %v904_v23 = vcvt.f32.s32 %v898_v19 }
 0x31d   : > { %v900_v21 = vsel %vm899_vm4, %v895_v20, inf }
 0x31e   : > { %901 = vmin.xlane.f32.xlu1 %v900_v21  ;;  %v905_v25 = vshll.u32 %v904_v23, 16 }
 0x337   : > { %928 = vrot.lane.b32.xlu1 %v882_v22, %s1505_s10 }
 0x33f   : > { %940 = vrot.lane.b32.xlu1 %v1729_v6, %s1506_s5  ;;  %s1450_s5 = scalar_lea.hbm %s1799_s8, 16 }
 0x340   : > { %p1452_p7 = scmp.lt.s32.totalorder %s1450_s5, %s1446_s15 }
 0x342   : > { %p1453_p9 = por %p1452_p7, %p1451_p8 }
 0x344   : > { %p1454_p10 = pnand %p1453_p9, %p1449_p12 }
 0x391   : > { %v902_v24 = vpop.xlane.xlu1 %901 }
 0x392   : > { %v903_v26 = vcvt.f32.s32 %v902_v24 }
 0x394   : > { %v906_v27 = vadd.s32 %v905_v25, %v903_v26 }
 0x396   : > { %vm907_vm6 = vcmp.eq.s32.totalorder %v1735_v12, %v906_v27 }
 0x397   : > { %v1234_v30 = vsel %vm907_vm6, 1.0, %v1507_v28 }
 0x398   : > { %v1328_v31 = vpack.i.bf16 %v1234_v30, %v1236_v29 }
 0x39a   : > { %1329 = vrot.lane.b32.xlu0 %v1328_v31, %s1508_s22 }
 0x3a9   : > { %v929_v34 = vpop.permute.xlu1 %928 }
 0x3aa   : > { %v931_v35 = vmul.f32 %v1365_v33, %v929_v34 }
 0x3ac   : > { %933 = vrot.lane.b32.xlu2 %v931_v35, %s1509_s13 }
 0x3b1   : > { %v941_v50 = vpop.permute.xlu1 %940 }
 0x3b2   : > { %v943_v51 = vsub.f32 %v938_v49, %v941_v50 }
 0x3b4   : > { %v1235_v52 = vadd.f32 -0.9189385, %v943_v51 }
 0x3b6   : > { %v965_v53 = vmul.f32 %v1236_v29, %v1235_v52 }
 0x3b8   : > { %v966_v54 = vmul.f32 %v1234_v30, %v965_v53 }
 0x3ba   : > { %v967_v55 = vsel %vm884_vm3, %v966_v54, 0.0 }
 0x3d5   : > { %917 = vadd.xlane.f32.xlu2 %v916_v40 }
 0x406   : > { %v934_v41 = vpop.permute.xlu2 %933 }
 0x407   : > { %v936_v43 = vadd.f32 %v934_v41, %v1729_v6 }
 0x40c   : > { %v1330_v42 = vpop.permute.xlu0 %1329 }
 0x40d   : > { %v1331_v44 = vunpack.i.l.bf16 %v1330_v42  ;;  %v1332_v45 = vunpack.i.h.bf16 %v1330_v42 }
 0x40f   : > { %v952_v46 = vmul.f32 %v1331_v44, %v936_v43 }
 0x411   : > { %v957_v47 = vmul.f32 %v1332_v45, %v952_v46 }
 0x413   : > { %959 = vrot.lane.b32.xlu0 %v957_v47, %s1509_s13 }
 0x43d   : > { %968 = vadd.xlane.f32.xlu0 %v967_v55 }
 0x448   : > { %v918_v56 = vpop.xlane.xlu2 %917 }
 0x449   : > { %1368 = vlog2.f32 %v918_v56 }
 0x44f   : > { %v1369_v57 = vpop.eup %1368 }
 0x450   : > { %v920_v58 = vmul.f32 0.6931472, %v1369_v57 }
 0x452   : > { %v921_v59 = vadd.f32 %v920_v58, %v912_v36 }
 0x454   : > { %v922_v60 = vsub.f32 %v1729_v6, %v921_v59 }
 0x456   : > { %v923_v61 = vmul.f32 %v1234_v30, %v922_v60 }
 0x458   : > { %v924_v62 = vsel %vm884_vm3, %v923_v61, 0.0 }
 0x459   : > { %925 = vadd.xlane.f32.xlu1 %v924_v62 }
 0x485   : > { %v960_v63 = vpop.permute.xlu0 %959 }
 0x486   : > { %v962_v0 = vsel %vm884_vm3, %v960_v63, 0.0 }
 0x487   : > { %963 = vadd.xlane.f32.xlu2 %v962_v0 }
 0x4b0   : > { %v969_v2 = vpop.xlane.xlu0 %968 }
 0x4cc   : > { %v926_v1 = vpop.xlane.xlu1 %925 }
 0x4cd   : > { %v970_v3 = vadd.f32 %v969_v2, %v926_v1 }
 0x4fa   : > { %v964_v4 = vpop.xlane.xlu2 %963 }
 0x4fb   : > { %v972_v5 = vsel %vm971_vm7, %v964_v4, %v1234_v30 }
 0x4fc   : > { %v974_v6 = vsel %vm973_vm8, %v970_v3, %v972_v5 }
 0x4fd   : > { %975 = vst [vmem:[%s378_s21] sm:$0xff] %v974_v6 }
 0x4fe   : > { %1457 = shalt.err (!%p1454_p10)
}
 0x4ff   : > { %1270 = dma.vmem_to_hbm [thread:$0]  (%p1615_p13), %s990_s11, 128, %s992_s9, %s977_s12  }
 0x500 PF: > { %s1003_s25 = sand.u32 1, %s1488_s27   ;;  %p1808_p11 = scmp.ge.s32.totalorder %s1500_s30, 2 }
 0x501   : > { %s1004_s16 = scalar_lea.sflag [#allocation4], %s1003_s25 }
 0x502   : > { %p1281_p0 = pnand %p1808_p11, %p1620_p4 }
 0x504   : > { %p1282_p2 = pneg %p1281_p0 }
 0x506   : > { %1483 = dma.done.wait (%p1282_p2), %s1004_s16, 128  }
 0x507   : > { %1485 = vsyncadd (%p1282_p2), %s1004_s16, 4294967168  ;;  %s1809_s20 = sld [smem:[#allocation11_spill]]  ;;  %p22_p6 = scmp.ge.s32.totalorder %s1595_s19, 4  }
 0x508   : > { %s1810_s27 = smov %s1492_s28  ;;  %s1811_s28 = smov %s1496_s29 }
 0x509   : > { %s1813_s30 = smov %s1595_s19  ;;  %24 = sbr.rel (!%p22_p6) target bundleno = 8 (0x8), region = 120 }
 0x50d   : > { %s1812_s29 = smov %s1809_s20 }
 0x50e   :  { %1010 = vsyncpa [#allocation3], 1 }
 0x50f   :  { %1012 = vsyncpa [#allocation3 + $0x1], 1 }
 0x510   :  { %1013 = vsyncpa [#allocation6], 1 }
 0x511   :  { %1014 = vsyncpa [#allocation4], 1 }
 0x512   :  { %1016 = vsyncpa [#allocation4 + $0x1], 1 }

</bundles_post_ra>
